<compile_context>
chip_gen: v7x
topology: tpu7x:2x2x1
jax: 0.10.0
libtpu: 0.0.40
codegen_flags: <defaults>
</compile_context>

<pallas_src>
import math

import jax
import jax.numpy as jnp
from jax.experimental import pallas as pl
from jax.experimental.pallas import tpu as pltpu


def _nndsvd_kernel(u_ref, vh_ref, s_ref, uo_ref, vo_ref):
    # u_ref : (TB, M, R)   lane axis = R, sublane axis = M
    # vh_ref: (TB, R, N)   as produced by jnp.linalg.svd
    # s_ref : (TB, 1, R)
    # uo_ref: (TB, M, R),  vo_ref: (TB, N, R)
    f32 = jnp.float32

    u = u_ref[...]                                   # (TB, M, R)
    # In-kernel minor-dim transpose (XLU) — avoids wrapper-side HBM passes
    # for both the vh input and the v output.
    v = jnp.swapaxes(vh_ref[...], -1, -2)            # (TB, N, R)

    up = jnp.maximum(u, 0.0)                         # relu(u)
    un = jnp.minimum(u, 0.0)                         # un^2 == relu(-u)^2 (no cancellation)
    vp = jnp.maximum(v, 0.0)
    vn = jnp.minimum(v, 0.0)

    # Squared column norms over the M / N (sublane) axis, accumulated in f32
    # (safe for bf16 inputs).  sqrt(s) and the final sqrt of the norms are
    # monotone on nonnegative values (s >= 0 for singular values), so they
    # cancel out of the comparison and are not computed here.
    upf, unf = up.astype(f32), un.astype(f32)
    vpf, vnf = vp.astype(f32), vn.astype(f32)
    upp = jnp.sum(upf * upf, axis=-2, keepdims=True)  # (TB, 1, R)
    unn = jnp.sum(unf * unf, axis=-2, keepdims=True)
    vpp = jnp.sum(vpf * vpf, axis=-2, keepdims=True)
    vnn = jnp.sum(vnf * vnf, axis=-2, keepdims=True)

    mask = (upp * vpp) >= (unn * vnn)                 # (TB, 1, R), per (batch, r)

    sqrt_s = jnp.sqrt(s_ref[...].astype(f32)).astype(u.dtype)   # (TB, 1, R)

    # relu(-x) = relu(x) - x; scale by sqrt(s) only at the final store.
    uo_ref[...] = (jnp.where(mask, up, up - u) * sqrt_s).astype(uo_ref.dtype)
    vo_ref[...] = (jnp.where(mask, vp, vp - v) * sqrt_s).astype(vo_ref.dtype)


def _pick_batch_tile(B, per_batch_bytes):
    """Largest divisor of B whose per-step footprint stays small.

    Targets ~2 MiB of double-buffered I/O per step with a conservative 4x
    live factor for in-kernel temporaries (transposed v tile, relu tiles),
    and prefers >= 4 grid steps with an even step count (v7x megacore).
    """
    budget = 8 * 1024 * 1024
    cap = max(1, budget // max(1, 4 * per_batch_bytes))
    if B >= 4:
        cap = min(cap, max(1, B // 4))   # keep >= 4 grid steps when B allows
    cap = min(cap, B)
    divisors = [d for d in range(1, cap + 1) if B % d == 0]
    even_steps = [d for d in divisors if (B // d) % 2 == 0]
    return max(even_steps) if even_steps else max(divisors)


def nndsvd_pallas(u, s, vh):
    """u: (B, M, R), s: (B, R), vh: (B, R, N) -> (u_out:(B,M,R), v_out:(B,N,R))."""
    B, M, R = u.shape
    N = vh.shape[-1]
    dtype = u.dtype

    s3 = s.reshape(B, 1, R)   # R on lanes: avoids a maximally-strided lane-1 DMA

    itemsize = jnp.dtype(dtype).itemsize
    per_batch = (2 * M * R + 2 * N * R + R) * itemsize
    tb = _pick_batch_tile(B, per_batch)
    grid = (B // tb,)

    # TODO(synk): B == 1 with very large M*R / N*R would need an M/N-tiled
    # two-pass path (norm-accumulate phase + apply phase); not implemented.

    uo, vo = pl.pallas_call(
        _nndsvd_kernel,
        out_shape=(jax.ShapeDtypeStruct((B, M, R), dtype),
                   jax.ShapeDtypeStruct((B, N, R), dtype)),
        grid_spec=pltpu.PrefetchScalarGridSpec(
            num_scalar_prefetch=0,
            grid=grid,
            in_specs=[pl.BlockSpec((tb, M, R), lambda b: (b, 0, 0)),
                      pl.BlockSpec((tb, R, N), lambda b: (b, 0, 0)),
                      pl.BlockSpec((tb, 1, R), lambda b: (b, 0, 0))],
            out_specs=[pl.BlockSpec((tb, M, R), lambda b: (b, 0, 0)),
                       pl.BlockSpec((tb, N, R), lambda b: (b, 0, 0))],
        ),
        compiler_params=pltpu.CompilerParams(
            dimension_semantics=("parallel",),
            # Fits every generation (v7x: 64 MiB physical per TC); the ~8 MiB
            # tile budget above leaves ample headroom for temporaries.
            vmem_limit_bytes=32 * 1024 * 1024),
        # u is dead after the call and matches the first output exactly.
        input_output_aliases={0: 0},
    )(u, vh, s3)

    return uo, vo


nndsvd_pallas_jit = jax.jit(nndsvd_pallas)


class NNDSVDInit:
    """JAX/Pallas port of factorizer's NNDSVDInit."""

    def __init__(self, size, rank=None, compression=10.0):
        M, N = size
        if rank is None:
            rank = max(math.ceil(M * N / (compression * (M + N))), 1)
        self.size = size
        self.rank = rank

    def decompose(self, x):
        # TODO(synk): torch.svd_lowrank (randomized range finder + QR) has no
        # clean Pallas equivalent; use XLA's jnp.linalg.svd and truncate to rank.
        u, s, vh = jnp.linalg.svd(x, full_matrices=False)
        R = self.rank
        return u[..., :, :R], s[..., :R], vh[..., :R, :]   # (B,M,R), (B,R), (B,R,N)

    def __call__(self, x):
        u, s, vh = self.decompose(x)
        return nndsvd_pallas_jit(u, s, vh)


def _reference_nndsvd(u, s, vh):
    """Pure-JAX reference of the post-SVD processing (mirrors the torch loop)."""
    v = jnp.swapaxes(vh, -1, -2)                  # (B, N, R)
    ss = jnp.sqrt(s)
    u = u * ss[:, None, :]
    v = v * ss[:, None, :]
    up, un = jnp.maximum(u, 0.0), jnp.maximum(-u, 0.0)
    vp, vn = jnp.maximum(v, 0.0), jnp.maximum(-v, 0.0)
    nup = jnp.linalg.norm(up, axis=1)
    nun = jnp.linalg.norm(un, axis=1)
    nvp = jnp.linalg.norm(vp, axis=1)
    nvn = jnp.linalg.norm(vn, axis=1)
    mask = (nup * nvp) >= (nun * nvn)             # (B, R)
    u_out = jnp.where(mask[:, None, :], up, un)
    v_out = jnp.where(mask[:, None, :], vp, vn)
    return u_out, v_out


if __name__ == "__main__":
    B, M, N, R = 2, 16, 16, 4
    key = jax.random.PRNGKey(0)
    x = jax.random.normal(key, (B, M, N), dtype=jnp.float32)

    mod = NNDSVDInit((M, N), rank=R)
    u_out, v_out = mod(x)
    jax.block_until_ready((u_out, v_out))

    # sanity check against a pure-JAX reference of the same math
    u_svd, s_svd, vh_svd = mod.decompose(x)
    u_ref, v_ref = _reference_nndsvd(u_svd, s_svd, vh_svd)
    assert u_out.shape == (B, M, R) and v_out.shape == (B, N, R)
    assert jnp.allclose(u_out, u_ref, rtol=1e-5, atol=1e-5)
    assert jnp.allclose(v_out, v_ref, rtol=1e-5, atol=1e-5)

    print("KERNEL_OK")
</pallas_src>

<mosaic_0001>
module attributes {stable_mosaic.version = 11 : i64} {
  func.func @_nndsvd_kernel(%arg0: i32, %arg1: memref<1x16x4xf32, #tpu.memory_space<vmem>>, %arg2: memref<1x4x16xf32, #tpu.memory_space<vmem>>, %arg3: memref<1x1x4xf32, #tpu.memory_space<vmem>>, %arg4: memref<1x16x4xf32, #tpu.memory_space<vmem>>, %arg5: memref<1x16x4xf32, #tpu.memory_space<vmem>>) attributes {dimension_semantics = [#tpu.dimension_semantics<parallel>], iteration_bounds = array<i64: 2>, scalar_prefetch = 0 : i64, scratch_operands = 0 : i64, tpu.core_type = #tpu.core_type<tc>, window_params = [{transform_indices = @transform_0, window_bounds = array<i64: 1, 16, 4>}, {transform_indices = @transform_1, window_bounds = array<i64: 1, 4, 16>}, {transform_indices = @transform_2, window_bounds = array<i64: 1, 1, 4>}, {transform_indices = @transform_3, window_bounds = array<i64: 1, 16, 4>}, {transform_indices = @transform_4, window_bounds = array<i64: 1, 16, 4>}]} {
    %c0 = arith.constant 0 : index
    %c0_0 = arith.constant 0 : index
    %c0_1 = arith.constant 0 : index
    %0 = vector.load %arg1[%c0, %c0_0, %c0_1] : memref<1x16x4xf32, #tpu.memory_space<vmem>>, vector<1x16x4xf32>
    %c0_2 = arith.constant 0 : index
    %c0_3 = arith.constant 0 : index
    %c0_4 = arith.constant 0 : index
    %1 = vector.load %arg2[%c0_2, %c0_3, %c0_4] : memref<1x4x16xf32, #tpu.memory_space<vmem>>, vector<1x4x16xf32>
    %2 = tpu.transpose %1, [0, 2, 1] : vector<1x4x16xf32> -> vector<1x16x4xf32>
    %cst = arith.constant 0.000000e+00 : f32
    %3 = vector.broadcast %cst : f32 to vector<1x16x4xf32>
    %4 = arith.maximumf %0, %3 : vector<1x16x4xf32>
    %cst_5 = arith.constant 0.000000e+00 : f32
    %5 = vector.broadcast %cst_5 : f32 to vector<1x16x4xf32>
    %6 = arith.minimumf %0, %5 : vector<1x16x4xf32>
    %cst_6 = arith.constant 0.000000e+00 : f32
    %7 = vector.broadcast %cst_6 : f32 to vector<1x16x4xf32>
    %8 = arith.maximumf %2, %7 : vector<1x16x4xf32>
    %cst_7 = arith.constant 0.000000e+00 : f32
    %9 = vector.broadcast %cst_7 : f32 to vector<1x16x4xf32>
    %10 = arith.minimumf %2, %9 : vector<1x16x4xf32>
    %11 = arith.mulf %4, %4 : vector<1x16x4xf32>
    %cst_8 = arith.constant dense<0.000000e+00> : vector<1x4xf32>
    %12 = vector.multi_reduction <add>, %11, %cst_8 [1] : vector<1x16x4xf32> to vector<1x4xf32>
    %13 = vector.shape_cast %12 : vector<1x4xf32> to vector<1x1x4xf32>
    %14 = arith.mulf %6, %6 : vector<1x16x4xf32>
    %cst_9 = arith.constant dense<0.000000e+00> : vector<1x4xf32>
    %15 = vector.multi_reduction <add>, %14, %cst_9 [1] : vector<1x16x4xf32> to vector<1x4xf32>
    %16 = vector.shape_cast %15 : vector<1x4xf32> to vector<1x1x4xf32>
    %17 = arith.mulf %8, %8 : vector<1x16x4xf32>
    %cst_10 = arith.constant dense<0.000000e+00> : vector<1x4xf32>
    %18 = vector.multi_reduction <add>, %17, %cst_10 [1] : vector<1x16x4xf32> to vector<1x4xf32>
    %19 = vector.shape_cast %18 : vector<1x4xf32> to vector<1x1x4xf32>
    %20 = arith.mulf %10, %10 : vector<1x16x4xf32>
    %cst_11 = arith.constant dense<0.000000e+00> : vector<1x4xf32>
    %21 = vector.multi_reduction <add>, %20, %cst_11 [1] : vector<1x16x4xf32> to vector<1x4xf32>
    %22 = vector.shape_cast %21 : vector<1x4xf32> to vector<1x1x4xf32>
    %23 = arith.mulf %13, %19 : vector<1x1x4xf32>
    %24 = arith.mulf %16, %22 : vector<1x1x4xf32>
    %25 = arith.cmpf oge, %23, %24 : vector<1x1x4xf32>
    %c0_12 = arith.constant 0 : index
    %c0_13 = arith.constant 0 : index
    %c0_14 = arith.constant 0 : index
    %26 = vector.load %arg3[%c0_12, %c0_13, %c0_14] : memref<1x1x4xf32, #tpu.memory_space<vmem>>, vector<1x1x4xf32>
    %27 = math.sqrt %26 : vector<1x1x4xf32>
    %28 = arith.subf %4, %0 : vector<1x16x4xf32>
    %29 = vector.shape_cast %25 : vector<1x1x4xi1> to vector<1x1x4xi1>
    %30 = vector.broadcast %29 : vector<1x1x4xi1> to vector<1x16x4xi1>
    %31 = arith.select %30, %4, %28 : vector<1x16x4xi1>, vector<1x16x4xf32>
    %32 = vector.broadcast %27 : vector<1x1x4xf32> to vector<1x16x4xf32>
    %33 = arith.mulf %31, %32 : vector<1x16x4xf32>
    %c0_15 = arith.constant 0 : index
    %c0_16 = arith.constant 0 : index
    %c0_17 = arith.constant 0 : index
    %34 = vector.load %arg4[%c0_15, %c0_16, %c0_17] : memref<1x16x4xf32, #tpu.memory_space<vmem>>, vector<1x16x4xf32>
    tpu.vector_store %arg4[%c0_15, %c0_16, %c0_17], %33 {strides = array<i32>} : memref<1x16x4xf32, #tpu.memory_space<vmem>>, vector<1x16x4xf32>,
    %35 = arith.subf %8, %2 : vector<1x16x4xf32>
    %36 = vector.shape_cast %25 : vector<1x1x4xi1> to vector<1x1x4xi1>
    %37 = vector.broadcast %36 : vector<1x1x4xi1> to vector<1x16x4xi1>
    %38 = arith.select %37, %8, %35 : vector<1x16x4xi1>, vector<1x16x4xf32>
    %39 = vector.broadcast %27 : vector<1x1x4xf32> to vector<1x16x4xf32>
    %40 = arith.mulf %38, %39 : vector<1x16x4xf32>
    %c0_18 = arith.constant 0 : index
    %c0_19 = arith.constant 0 : index
    %c0_20 = arith.constant 0 : index
    %41 = vector.load %arg5[%c0_18, %c0_19, %c0_20] : memref<1x16x4xf32, #tpu.memory_space<vmem>>, vector<1x16x4xf32>
    tpu.vector_store %arg5[%c0_18, %c0_19, %c0_20], %40 {strides = array<i32>} : memref<1x16x4xf32, #tpu.memory_space<vmem>>, vector<1x16x4xf32>,
    return
  }
  func.func @transform_0(%arg0: i32) -> (i32, i32, i32) {
    %c0_i32 = arith.constant 0 : i32
    %c0_i32_0 = arith.constant 0 : i32
    %c0_i32_1 = arith.constant 0 : i32
    return %arg0, %c0_i32, %c0_i32_0 : i32, i32, i32
  }
  func.func @transform_1(%arg0: i32) -> (i32, i32, i32) {
    %c0_i32 = arith.constant 0 : i32
    %c0_i32_0 = arith.constant 0 : i32
    %c0_i32_1 = arith.constant 0 : i32
    return %arg0, %c0_i32, %c0_i32_0 : i32, i32, i32
  }
  func.func @transform_2(%arg0: i32) -> (i32, i32, i32) {
    %c0_i32 = arith.constant 0 : i32
    %c0_i32_0 = arith.constant 0 : i32
    %c0_i32_1 = arith.constant 0 : i32
    return %arg0, %c0_i32, %c0_i32_0 : i32, i32, i32
  }
  func.func @transform_3(%arg0: i32) -> (i32, i32, i32) {
    %c0_i32 = arith.constant 0 : i32
    %c0_i32_0 = arith.constant 0 : i32
    %c0_i32_1 = arith.constant 0 : i32
    return %arg0, %c0_i32, %c0_i32_0 : i32, i32, i32
  }
  func.func @transform_4(%arg0: i32) -> (i32, i32, i32) {
    %c0_i32 = arith.constant 0 : i32
    %c0_i32_0 = arith.constant 0 : i32
    %c0_i32_1 = arith.constant 0 : i32
    return %arg0, %c0_i32, %c0_i32_0 : i32, i32, i32
  }
}

</mosaic_0001>

<bundles_post_ra>
// kernel: nndsvd_pallas.1
= control target key start
LH: loop header
LB: loop body
LE: loop exit
PB: predicated region body
PF: predicated region fallthrough
CT: control target
= control target key end

     0   :  { %s535_s15 = smov 0   ;;  %s605_s0 = inlined_call_operand.vmem [shape: f32[2,16,4], index: 0, kind: input, shape index: {}, may-alias: {0,3}]   ;;  %s606_s1 = inlined_call_operand.vmem [shape: f32[2,4,16], index: 1, kind: input, shape index: {}]   ;;  %s607_s2 = inlined_call_operand.vmem [shape: f32[2,1,4], index: 2, kind: input, shape index: {}]   ;;  %s608_s3 = inlined_call_operand.vmem [shape: f32[2,16,4], index: 3, kind: output, shape index: {0}, may-alias: {0,3}]   ;;  %s609_s4 = inlined_call_operand.vmem [shape: f32[2,16,4], index: 4, kind: output, shape index: {1}]  }
   0x1 LB: > { %s474_s16 = sadd.s32 4294967295, %s508_s15   ;;  %p478_p0 = scmp.ge.s32.totalorder %s508_s15, 1  ;;  %s508_s15 = sphi %s535_s15, %s15_s15  }
   0x2   : > { %p182_p1 = scmp.lt.s32.totalorder %s508_s15, 3 }
   0x4   : > { %p183_p2 = pnand %p478_p0, %p182_p1 }
   0x5   : > { %p220_p3 = scmp.lt.s32.totalorder (!%p183_p2), %s474_s16, 1  ;;  %vm287_vm0 = vcmask (!%p183_p2), 31744   ;;  %v348_v41 = vlaneseq (!%p183_p2) }
   0x6   : > { %186 = sbr.rel (%p183_p2) target bundleno = 177 (0xb1), region = 32 }
   0x7   : > { %v349_v49 = vshrl.u32 (!%p183_p2), %v348_v41, 7 }
   0x9   : > { %v350_v58 = vsub.s32 (!%p183_p2), 0, %v349_v49 }
   0xd   : > { %s611_s16 = smov (!%p220_p3, %s474_s16), 1 }
   0xe   : > { %s481_s17 = sshll.u32 %s611_s16, 2  ;;  %s546_s21 = sshll.u32 %s611_s16, 4 }
   0xf   : > { %s228_s20 = scalar_lea.vmem %s606_s1, %s481_s17  ;;  %s224_s24 = scalar_lea.vmem %s605_s0, %s546_s21 }
  0x10   : > { %v244_v0 = vld [vmem:[%s228_s20] sm:$0xf]  ;;  %v554_v2 = vld [vmem:[%s224_s24 + $0x8] sm:$0xff]  ;;  %s231_s27 = scalar_lea.vmem %s607_s2, %s611_s16  ;;  %s236_s30 = scalar_lea.vmem %s608_s3, %s546_s21 }
  0x11   : > { %245 = vxpose.xlu0.b32.start.end [1/1] (short) (narrow) %v244_v0, 16  ;;  %v552_v1 = vld [vmem:[%s224_s24] sm:$0xff]  ;;  %v280_v4 = vmin.f32 %v554_v2, 0.0  ;;  %v562_v6 = vmax.f32 %v554_v2, 0.0  ;;  %s241_s7 = scalar_lea.vmem %s609_s4, %s546_s21 }
  0x12   : > { %v279_v3 = vmin.f32 %v552_v1, 0.0  ;;  %v559_v5 = vmax.f32 %v552_v1, 0.0  ;;  %v333_v17 = vld [vmem:[%s231_s27] sm:$0x1] }
  0x13   : > { %v298_v8 = vmul.f32 %v280_v4, %v280_v4  ;;  %v286_v10 = vmul.f32 %v562_v6, %v562_v6  ;;  %500 = vrsqrt.f32 %v333_v17  ;;  %vm336_vm1 = vcmp.eq.f32.partialorder %v333_v17, inf }
  0x14   : > { %v297_v7 = vmul.f32 %v279_v3, %v279_v3  ;;  %v285_v9 = vmul.f32 %v559_v5, %v559_v5  ;;  %v339_v54 = vand.u32 2147483648, %v333_v17  ;;  %vm338_vm2 = vcmp.eq.f32.partialorder %v333_v17, 0.0 }
  0x15   : > { %v289_v12 = vsel %vm287_vm0, %v286_v10, 0.0  ;;  %v300_v14 = vsel %vm287_vm0, %v298_v8, 0.0  ;;  %v341_v4 = vsub.f32 %v559_v5, %v552_v1 }
  0x16   : > { %v288_v11 = vsel %vm287_vm0, %v285_v9, 0.0  ;;  %v299_v13 = vsel %vm287_vm0, %v297_v7, 0.0  ;;  %v342_v7 = vsub.f32 %v562_v6, %v554_v2 }
  0x17   : > { %v290_v15 = vadd.f32 %v289_v12, %v288_v11  ;;  %v301_v16 = vadd.f32 %v300_v14, %v299_v13 }
  0x19   : > { %v291_v19 = vrot.slane %v290_v15, 4  ;;  %v302_v20 = vrot.slane %v301_v16, 4 }
  0x1b   : > { %v292_v24 = vadd.f32 %v291_v19, %v290_v15  ;;  %v303_v25 = vadd.f32 %v302_v20, %v301_v16 }
  0x1d   : > { %v293_v32 = vrot.slane %v292_v24, 2  ;;  %v304_v33 = vrot.slane %v303_v25, 2  ;;  %v501_v40 = vpop.eup %500 }
  0x1e   : > { %v335_v46 = vmul.f32 %v501_v40, %v333_v17 }
  0x1f   : > { %v294_v42 = vadd.f32 %v293_v32, %v292_v24  ;;  %v305_v43 = vadd.f32 %v304_v33, %v303_v25 }
  0x20   : > { %v337_v55 = vsel %vm336_vm1, %v333_v17, %v335_v46 }
  0x21   : > { %v295_v50 = vrot.slane %v294_v42, 1  ;;  %v306_v51 = vrot.slane %v305_v43, 1  ;;  %v340_v63 = vsel %vm338_vm2, %v339_v54, %v337_v55 }
  0x22   : > { %v351_v8 = vrot.slane %v340_v63, %v350_v58 }
  0x23   : > { %v296_v59 = vadd.f32 %v295_v50, %v294_v42  ;;  %v307_v60 = vadd.f32 %v306_v51, %v305_v43 }
  0x91   : > { %v575_v18 = vpop.trf.xlu0 }
  0x92   : > { %v281_v21 = vmax.f32 %v575_v18, 0.0  ;;  %v283_v22 = vmin.f32 %v575_v18, 0.0 }
  0x94   : > { %v308_v26 = vmul.f32 %v281_v21, %v281_v21  ;;  %v319_v27 = vmul.f32 %v283_v22, %v283_v22  ;;  %v357_v11 = vsub.f32 %v281_v21, %v575_v18 }
  0x95   : > { %v262_v23 = vpop.trf.xlu0 }
  0x96   : > { %v282_v28 = vmax.f32 %v262_v23, 0.0  ;;  %v284_v29 = vmin.f32 %v262_v23, 0.0  ;;  %v310_v34 = vsel %vm287_vm0, %v308_v26, 0.0  ;;  %v321_v35 = vsel %vm287_vm0, %v319_v27, 0.0 }
  0x98   : > { %v309_v30 = vmul.f32 %v282_v28, %v282_v28  ;;  %v320_v31 = vmul.f32 %v284_v29, %v284_v29  ;;  %v358_v12 = vsub.f32 %v282_v28, %v262_v23 }
  0x9a   : > { %v311_v36 = vsel %vm287_vm0, %v309_v30, 0.0  ;;  %v322_v37 = vsel %vm287_vm0, %v320_v31, 0.0 }
  0x9b   : > { %v312_v38 = vadd.f32 %v311_v36, %v310_v34  ;;  %v323_v39 = vadd.f32 %v322_v37, %v321_v35 }
  0x9d   : > { %v313_v44 = vrot.slane %v312_v38, 4  ;;  %v324_v45 = vrot.slane %v323_v39, 4 }
  0x9f   : > { %v314_v47 = vadd.f32 %v313_v44, %v312_v38  ;;  %v325_v48 = vadd.f32 %v324_v45, %v323_v39 }
  0xa1   : > { %v315_v52 = vrot.slane %v314_v47, 2  ;;  %v326_v53 = vrot.slane %v325_v48, 2 }
  0xa3   : > { %v316_v56 = vadd.f32 %v315_v52, %v314_v47  ;;  %v327_v57 = vadd.f32 %v326_v53, %v325_v48 }
  0xa5   : > { %v317_v61 = vrot.slane %v316_v56, 1  ;;  %v328_v62 = vrot.slane %v327_v57, 1 }
  0xa7   : > { %v318_v0 = vadd.f32 %v317_v61, %v316_v56  ;;  %v329_v3 = vadd.f32 %v328_v62, %v327_v57 }
  0xa9   : > { %v330_v9 = vmul.f32 %v318_v0, %v296_v59  ;;  %v331_v10 = vmul.f32 %v329_v3, %v307_v60 }
  0xab   : > { %vm332_vm3 = vcmp.ge.f32.partialorder %v330_v9, %v331_v10 }
  0xac   : > { %v345_v1 = vsel %vm332_vm3, %v559_v5, %v341_v4  ;;  %v346_v13 = vsel %vm332_vm3, %v562_v6, %v342_v7  ;;  %v359_v2 = vsel %vm332_vm3, %v281_v21, %v357_v11  ;;  %v360_v14 = vsel %vm332_vm3, %v282_v28, %v358_v12 }
  0xad   : > { %v353_v15 = vmul.f32 %v351_v8, %v345_v1  ;;  %v354_v16 = vmul.f32 %v351_v8, %v346_v13  ;;  %v361_v17 = vmul.f32 %v359_v2, %v351_v8  ;;  %v362_v18 = vmul.f32 %v360_v14, %v351_v8 }
  0xaf   : > { %355 = vst.msk [vmem:[%s236_s30] sm:$0xff] %vm287_vm0, %v353_v15  ;;  %356 = vst.msk [vmem:[%s236_s30 + $0x8] sm:$0xff] %vm287_vm0, %v354_v16 }
  0xb0   : > { %363 = vst.msk [vmem:[%s241_s7] sm:$0xff] %vm287_vm0, %v361_v17  ;;  %364 = vst.msk [vmem:[%s241_s7 + $0x8] sm:$0xff] %vm287_vm0, %v362_v18 }
  0xb1 PF: > { %s15_s15 = sadd.s32 1, %s508_s15  }
  0xb2   : > { %p12_p4 = scmp.ge.s32.totalorder %s15_s15, 4  }
  0xb4   :  { %14 = sbr.rel (!%p12_p4) target bundleno = 1 (0x1), region = 80 }

</bundles_post_ra>
